<compile_context>
chip_gen: v5e
topology: v5e:2x2
jax: 0.10.0
libtpu: 0.0.40
codegen_flags: <defaults>
</compile_context>

<pallas_src>
import functools

import jax
import jax.numpy as jnp
from jax.experimental import pallas as pl
from jax.experimental.pallas import tpu as pltpu

LANE = 128  # MXU / lane width; fused head weight slab is padded to a multiple of this


def _round_up(x, m):
    return ((x + m - 1) // m) * m


def _policy_kernel(obs_ref, w1_ref, b1_ref, w2_ref, b2_ref, wh_ref, bh_ref, out_ref):
    # Hidden layer 1: Linear + ReLU (bf16 MXU inputs, f32 accumulation)
    x = obs_ref[...].astype(jnp.bfloat16)
    h = jnp.dot(x, w1_ref[...], preferred_element_type=jnp.float32) + b1_ref[...]
    h = jnp.maximum(h, 0.0)
    # Hidden layer 2: Linear + ReLU (mlp output_activation is ReLU)
    h = jnp.dot(h.astype(jnp.bfloat16), w2_ref[...],
                preferred_element_type=jnp.float32) + b2_ref[...]
    h = jnp.maximum(h, 0.0)
    # Fused reward+cost heads: one MXU push at N=128 (lane-padded weight slab),
    # then slice the useful 2*act_dim lanes before bias/tanh/store so the HBM
    # write stream only carries useful bytes.
    y = jnp.dot(h.astype(jnp.bfloat16), wh_ref[...],
                preferred_element_type=jnp.float32)
    out_cols = out_ref.shape[-1]            # 2 * act_dim (static)
    y = y[:, :out_cols] + bh_ref[...]
    out_ref[...] = jnp.tanh(y)


def pack_params(raw_params):
    """Pack PyTorch-layout params for the kernel.

    raw_params: (w1, b1, w2, b2, wr, br, wc, bc) in f32 with weights stored as
    (in_features, out_features) and biases (1, out_features).
    Returns (packed_params, act_dim).  The two heads are fused into one
    lane-dense (hidden, round_up(2*act_dim, 128)) bf16 slab (full MXU width),
    while the fused bias is kept compact at (1, 2*act_dim) f32.
    """
    w1, b1, w2, b2, wr, br, wc, bc = raw_params
    hidden = w2.shape[1]
    act_dim = wr.shape[1]
    out_cols = 2 * act_dim
    head_n = _round_up(out_cols, LANE)      # keep N=128k for the MXU (v5e especially)

    wh = jnp.zeros((hidden, head_n), jnp.float32)
    wh = wh.at[:, :act_dim].set(wr).at[:, act_dim:out_cols].set(wc)
    bh = jnp.concatenate([br.reshape(1, -1), bc.reshape(1, -1)],
                         axis=1).astype(jnp.float32)        # (1, 2*act_dim)

    packed = (w1.astype(jnp.bfloat16), b1.reshape(1, -1).astype(jnp.float32),
              w2.astype(jnp.bfloat16), b2.reshape(1, -1).astype(jnp.float32),
              wh.astype(jnp.bfloat16), bh)
    return packed, act_dim


def _pick_tile(B, tile_b):
    """Batch tile: multiple of 8, <= B, and >=2 grid steps for mid/large B (v7x)."""
    if B < 8:
        return B                              # single block == full (tiny) batch
    if B <= 64:
        return (B // 8) * 8                   # 1-2 blocks; launch-latency dominated anyway
    tb = min(tile_b, _round_up(-(-B // 2), 8))   # aim for >= 2 steps (2 TCs on v7x)
    return min(tb, (B // 8) * 8)


def _padded_bytes(rows, cols, itemsize):
    """VMEM footprint of a (rows, cols) buffer after (8,128) layout padding."""
    return _round_up(rows, 8) * _round_up(cols, LANE) * itemsize


@functools.partial(jax.jit, static_argnames=("act_dim", "tile_b"))
def deterministic_policy_forward(obs, packed_params, act_dim, tile_b=1024):
    """obs: (B, state_dim) f32 -> (action_reward, action_cost), each (B, act_dim) f32."""
    w1, b1, w2, b2, wh, bh = packed_params
    B, state_dim = obs.shape
    hidden = w1.shape[1]
    head_n = wh.shape[1]                      # 128-multiple MXU slab width
    out_cols = bh.shape[1]                    # 2 * act_dim (compact output width)

    tb = _pick_tile(B, tile_b)
    grid = (pl.cdiv(B, tb),)                  # ragged last block handled by Pallas masking

    # Realistic VMEM budget: double-buffered obs/out tiles + resident weights +
    # a few live (tb, hidden) f32 intermediates, plus headroom for compiler scratch.
    est = (2 * _padded_bytes(tb, state_dim, 4)          # obs (double-buffered)
           + 2 * _padded_bytes(tb, out_cols, 4)         # out (double-buffered)
           + _padded_bytes(state_dim, hidden, 2)        # W1 (bf16)
           + _padded_bytes(hidden, hidden, 2)           # W2 (bf16)
           + _padded_bytes(hidden, head_n, 2)           # fused head W (bf16)
           + 4 * _padded_bytes(tb, max(hidden, head_n), 4))   # live intermediates
    vmem_limit = min(96 * 1024 * 1024, est + 10 * 1024 * 1024)

    const2d = lambda i: (0, 0)  # weights/biases: VMEM-resident, never re-DMA'd

    out = pl.pallas_call(
        _policy_kernel,
        out_shape=jax.ShapeDtypeStruct((B, out_cols), jnp.float32),
        grid=grid,
        in_specs=[
            pl.BlockSpec((tb, state_dim), lambda i: (i, 0)),   # obs tile
            pl.BlockSpec((state_dim, hidden), const2d),        # W1
            pl.BlockSpec((1, hidden), const2d),                # b1
            pl.BlockSpec((hidden, hidden), const2d),           # W2
            pl.BlockSpec((1, hidden), const2d),                # b2
            pl.BlockSpec((hidden, head_n), const2d),           # fused head W (N=128k)
            pl.BlockSpec((1, out_cols), const2d),              # fused head b (compact)
        ],
        out_specs=pl.BlockSpec((tb, out_cols), lambda i: (i, 0)),
        compiler_params=pltpu.CompilerParams(
            dimension_semantics=("parallel",),          # megacore sharding on v7x
            vmem_limit_bytes=int(vmem_limit),
        ),
    )(obs, w1, b1, w2, b2, wh, bh)

    # Compact output: these column slices are cheap (out is only 2*act_dim wide).
    action_reward = out[:, :act_dim]
    action_cost = out[:, act_dim:out_cols]
    return action_reward, action_cost


def init_params(key, state_dim, hidden_dim, act_dim):
    """Deterministic synthetic parameters (PyTorch-like uniform fan-in init)."""
    def linear_init(k, fan_in, fan_out):
        k_w, k_b = jax.random.split(k)
        bound = 1.0 / jnp.sqrt(fan_in)
        w = jax.random.uniform(k_w, (fan_in, fan_out), jnp.float32, -bound, bound)
        b = jax.random.uniform(k_b, (1, fan_out), jnp.float32, -bound, bound)
        return w, b

    k1, k2, k3, k4 = jax.random.split(key, 4)
    w1, b1 = linear_init(k1, state_dim, hidden_dim)
    w2, b2 = linear_init(k2, hidden_dim, hidden_dim)
    wr, br = linear_init(k3, hidden_dim, act_dim)
    wc, bc = linear_init(k4, hidden_dim, act_dim)
    return (w1, b1, w2, b2, wr, br, wc, bc)


def reference_forward(obs, raw_params):
    """Pure-JAX reference with the same bf16-at-dot / f32-accumulate convention."""
    w1, b1, w2, b2, wr, br, wc, bc = raw_params
    bf = jnp.bfloat16
    h = jnp.maximum(jnp.dot(obs.astype(bf), w1.astype(bf),
                            preferred_element_type=jnp.float32) + b1, 0.0)
    h = jnp.maximum(jnp.dot(h.astype(bf), w2.astype(bf),
                            preferred_element_type=jnp.float32) + b2, 0.0)
    ar = jnp.tanh(jnp.dot(h.astype(bf), wr.astype(bf),
                          preferred_element_type=jnp.float32) + br)
    ac = jnp.tanh(jnp.dot(h.astype(bf), wc.astype(bf),
                          preferred_element_type=jnp.float32) + bc)
    return ar, ac


if __name__ == "__main__":
    key = jax.random.PRNGKey(0)

    # --- Small shapes consistent with the module's forward ---
    batch, state_dim, hidden_dim, act_dim = 8, 16, 32, 4
    k_obs, k_params, k_obs2, k_params2 = jax.random.split(key, 4)

    obs = jax.random.normal(k_obs, (batch, state_dim), dtype=jnp.float32)
    raw = init_params(k_params, state_dim, hidden_dim, act_dim)
    packed, ad = pack_params(raw)

    ar, ac = deterministic_policy_forward(obs, packed, ad)
    jax.block_until_ready((ar, ac))

    ar_ref, ac_ref = reference_forward(obs, raw)
    assert ar.shape == (batch, act_dim) and ac.shape == (batch, act_dim)
    assert jnp.allclose(ar, ar_ref, atol=1e-3, rtol=1e-3)
    assert jnp.allclose(ac, ac_ref, atol=1e-3, rtol=1e-3)

    # --- Larger batch exercising the batch grid, ragged last block, hidden=256 ---
    batch2, state_dim2, hidden2, act_dim2 = 1000, 17, 256, 6
    obs2 = jax.random.normal(k_obs2, (batch2, state_dim2), dtype=jnp.float32)
    raw2 = init_params(k_params2, state_dim2, hidden2, act_dim2)
    packed2, ad2 = pack_params(raw2)

    ar2, ac2 = deterministic_policy_forward(obs2, packed2, ad2)
    jax.block_until_ready((ar2, ac2))

    ar2_ref, ac2_ref = reference_forward(obs2, raw2)
    assert ar2.shape == (batch2, act_dim2) and ac2.shape == (batch2, act_dim2)
    assert jnp.allclose(ar2, ar2_ref, atol=1e-3, rtol=1e-3)
    assert jnp.allclose(ac2, ac2_ref, atol=1e-3, rtol=1e-3)

    print("KERNEL_OK")
</pallas_src>

<mosaic_0001>
module attributes {stable_mosaic.version = 11 : i64} {
  func.func @_policy_kernel(%arg0: i32, %arg1: memref<8x16xf32, #tpu.memory_space<vmem>>, %arg2: memref<16x32xbf16, #tpu.memory_space<vmem>>, %arg3: memref<1x32xf32, #tpu.memory_space<vmem>>, %arg4: memref<32x32xbf16, #tpu.memory_space<vmem>>, %arg5: memref<1x32xf32, #tpu.memory_space<vmem>>, %arg6: memref<32x128xbf16, #tpu.memory_space<vmem>>, %arg7: memref<1x8xf32, #tpu.memory_space<vmem>>, %arg8: memref<8x8xf32, #tpu.memory_space<vmem>>) attributes {dimension_semantics = [#tpu.dimension_semantics<parallel>], iteration_bounds = array<i64: 1>, scalar_prefetch = 0 : i64, scratch_operands = 0 : i64, tpu.core_type = #tpu.core_type<tc>, window_params = [{transform_indices = @transform_0, window_bounds = array<i64: 8, 16>}, {pipeline_mode = #tpu.pipeline_mode<synchronous>, transform_indices = @transform_1, window_bounds = array<i64: 16, 32>}, {pipeline_mode = #tpu.pipeline_mode<synchronous>, transform_indices = @transform_2, window_bounds = array<i64: 1, 32>}, {pipeline_mode = #tpu.pipeline_mode<synchronous>, transform_indices = @transform_3, window_bounds = array<i64: 32, 32>}, {pipeline_mode = #tpu.pipeline_mode<synchronous>, transform_indices = @transform_4, window_bounds = array<i64: 1, 32>}, {pipeline_mode = #tpu.pipeline_mode<synchronous>, transform_indices = @transform_5, window_bounds = array<i64: 32, 128>}, {pipeline_mode = #tpu.pipeline_mode<synchronous>, transform_indices = @transform_6, window_bounds = array<i64: 1, 8>}, {transform_indices = @transform_7, window_bounds = array<i64: 8, 8>}]} {
    %c0 = arith.constant 0 : index
    %c0_0 = arith.constant 0 : index
    %0 = vector.load %arg1[%c0, %c0_0] : memref<8x16xf32, #tpu.memory_space<vmem>>, vector<8x16xf32>
    %1 = arith.truncf %0 : vector<8x16xf32> to vector<8x16xbf16>
    %c0_1 = arith.constant 0 : index
    %c0_2 = arith.constant 0 : index
    %2 = vector.load %arg2[%c0_1, %c0_2] : memref<16x32xbf16, #tpu.memory_space<vmem>>, vector<16x32xbf16>
    %cst = arith.constant dense<0.000000e+00> : vector<8x32xf32>
    %3 = tpu.matmul %1, %2, %cst {dimension_numbers = #tpu.dot_dimension_numbers<[1], [0], [0], [1], [0, 0, 1, 1], [], []>} : vector<8x16xbf16>, vector<16x32xbf16>, vector<8x32xf32> -> vector<8x32xf32>
    %c0_3 = arith.constant 0 : index
    %c0_4 = arith.constant 0 : index
    %4 = vector.load %arg3[%c0_3, %c0_4] : memref<1x32xf32, #tpu.memory_space<vmem>>, vector<1x32xf32>
    %5 = vector.broadcast %4 : vector<1x32xf32> to vector<8x32xf32>
    %6 = arith.addf %3, %5 : vector<8x32xf32>
    %cst_5 = arith.constant 0.000000e+00 : f32
    %7 = vector.broadcast %cst_5 : f32 to vector<8x32xf32>
    %8 = arith.maximumf %6, %7 : vector<8x32xf32>
    %9 = arith.truncf %8 : vector<8x32xf32> to vector<8x32xbf16>
    %c0_6 = arith.constant 0 : index
    %c0_7 = arith.constant 0 : index
    %10 = vector.load %arg4[%c0_6, %c0_7] : memref<32x32xbf16, #tpu.memory_space<vmem>>, vector<32x32xbf16>
    %cst_8 = arith.constant dense<0.000000e+00> : vector<8x32xf32>
    %11 = tpu.matmul %9, %10, %cst_8 {dimension_numbers = #tpu.dot_dimension_numbers<[1], [0], [0], [1], [0, 0, 1, 1], [], []>} : vector<8x32xbf16>, vector<32x32xbf16>, vector<8x32xf32> -> vector<8x32xf32>
    %c0_9 = arith.constant 0 : index
    %c0_10 = arith.constant 0 : index
    %12 = vector.load %arg5[%c0_9, %c0_10] : memref<1x32xf32, #tpu.memory_space<vmem>>, vector<1x32xf32>
    %13 = vector.broadcast %12 : vector<1x32xf32> to vector<8x32xf32>
    %14 = arith.addf %11, %13 : vector<8x32xf32>
    %cst_11 = arith.constant 0.000000e+00 : f32
    %15 = vector.broadcast %cst_11 : f32 to vector<8x32xf32>
    %16 = arith.maximumf %14, %15 : vector<8x32xf32>
    %17 = arith.truncf %16 : vector<8x32xf32> to vector<8x32xbf16>
    %c0_12 = arith.constant 0 : index
    %c0_13 = arith.constant 0 : index
    %18 = vector.load %arg6[%c0_12, %c0_13] : memref<32x128xbf16, #tpu.memory_space<vmem>>, vector<32x128xbf16>
    %cst_14 = arith.constant dense<0.000000e+00> : vector<8x128xf32>
    %19 = tpu.matmul %17, %18, %cst_14 {dimension_numbers = #tpu.dot_dimension_numbers<[1], [0], [0], [1], [0, 0, 1, 1], [], []>} : vector<8x32xbf16>, vector<32x128xbf16>, vector<8x128xf32> -> vector<8x128xf32>
    %20 = vector.extract_strided_slice %19 {offsets = [0, 0], sizes = [8, 8], strides = [1, 1]} : vector<8x128xf32> to vector<8x8xf32>
    %c0_15 = arith.constant 0 : index
    %c0_16 = arith.constant 0 : index
    %21 = vector.load %arg7[%c0_15, %c0_16] : memref<1x8xf32, #tpu.memory_space<vmem>>, vector<1x8xf32>
    %22 = vector.broadcast %21 : vector<1x8xf32> to vector<8x8xf32>
    %23 = arith.addf %20, %22 : vector<8x8xf32>
    %24 = math.tanh %23 : vector<8x8xf32>
    %c0_17 = arith.constant 0 : index
    %c0_18 = arith.constant 0 : index
    %25 = vector.load %arg8[%c0_17, %c0_18] : memref<8x8xf32, #tpu.memory_space<vmem>>, vector<8x8xf32>
    tpu.vector_store %arg8[%c0_17, %c0_18], %24 {strides = array<i32>} : memref<8x8xf32, #tpu.memory_space<vmem>>, vector<8x8xf32>,
    return
  }
  func.func @transform_0(%arg0: i32) -> (i32, i32) {
    %c0_i32 = arith.constant 0 : i32
    %c0_i32_0 = arith.constant 0 : i32
    return %arg0, %c0_i32 : i32, i32
  }
  func.func @transform_1(%arg0: i32) -> (i32, i32) {
    %c0_i32 = arith.constant 0 : i32
    %c0_i32_0 = arith.constant 0 : i32
    %c0_i32_1 = arith.constant 0 : i32
    return %c0_i32, %c0_i32_0 : i32, i32
  }
  func.func @transform_2(%arg0: i32) -> (i32, i32) {
    %c0_i32 = arith.constant 0 : i32
    %c0_i32_0 = arith.constant 0 : i32
    %c0_i32_1 = arith.constant 0 : i32
    return %c0_i32, %c0_i32_0 : i32, i32
  }
  func.func @transform_3(%arg0: i32) -> (i32, i32) {
    %c0_i32 = arith.constant 0 : i32
    %c0_i32_0 = arith.constant 0 : i32
    %c0_i32_1 = arith.constant 0 : i32
    return %c0_i32, %c0_i32_0 : i32, i32
  }
  func.func @transform_4(%arg0: i32) -> (i32, i32) {
    %c0_i32 = arith.constant 0 : i32
    %c0_i32_0 = arith.constant 0 : i32
    %c0_i32_1 = arith.constant 0 : i32
    return %c0_i32, %c0_i32_0 : i32, i32
  }
  func.func @transform_5(%arg0: i32) -> (i32, i32) {
    %c0_i32 = arith.constant 0 : i32
    %c0_i32_0 = arith.constant 0 : i32
    %c0_i32_1 = arith.constant 0 : i32
    return %c0_i32, %c0_i32_0 : i32, i32
  }
  func.func @transform_6(%arg0: i32) -> (i32, i32) {
    %c0_i32 = arith.constant 0 : i32
    %c0_i32_0 = arith.constant 0 : i32
    %c0_i32_1 = arith.constant 0 : i32
    return %c0_i32, %c0_i32_0 : i32, i32
  }
  func.func @transform_7(%arg0: i32) -> (i32, i32) {
    %c0_i32 = arith.constant 0 : i32
    %c0_i32_0 = arith.constant 0 : i32
    return %arg0, %c0_i32 : i32, i32
  }
}

</mosaic_0001>

<bundles_post_ra>
// kernel: deterministic_policy_forward.1
= control target key start
LH: loop header
LB: loop body
LE: loop exit
PB: predicated region body
PF: predicated region fallthrough
CT: control target
= control target key end

     0   :  { %12 = vsyncpa [#allocation3], 0  ;;  %s418_s0 = inlined_call_operand.hbm [shape: f32[8,16], index: 0, kind: input, shape index: {}]   ;;  %s419_s1 = inlined_call_operand.hbm [shape: bf16[16,32], index: 1, kind: input, shape index: {}]   ;;  %s420_s2 = inlined_call_operand.vmem [shape: f32[1,32], index: 2, kind: input, shape index: {}]   ;;  %s421_s3 = inlined_call_operand.hbm [shape: bf16[32,32], index: 3, kind: input, shape index: {}]   ;;  %s422_s4 = inlined_call_operand.vmem [shape: f32[1,32], index: 4, kind: input, shape index: {}]   ;;  %s423_s5 = inlined_call_operand.hbm [shape: bf16[32,128], index: 5, kind: input, shape index: {}]   ;;  %s424_s6 = inlined_call_operand.vmem [shape: f32[1,8], index: 6, kind: input, shape index: {}]   ;;  %s425_s7 = inlined_call_operand.vmem [shape: f32[8,8], index: 7, kind: output, shape index: {}]  }
   0x1   :  { %13 = vsyncpa [#allocation5], 0  ;;  %s30_s26 = sshll.u32 %s419_s1, 4  ;;  %s31_s26 = int_to_ptr.hbm [resolvable:$true] %s30_s26 }
   0x2   :  { %14 = vsyncpa [#allocation8], 0  ;;  %s348_s27 = smov [#allocation4]   ;;  %s20_s8 = sshll.u32 %s418_s0, 4  ;;  %s21_s8 = int_to_ptr.hbm [resolvable:$true] %s20_s8 }
   0x3   :  { %s32_s28 = sshll.u32 %s348_s27, 4  ;;  %s349_s9 = smov 64   ;;  %s33_s28 = int_to_ptr.vmem [resolvable:$true] %s32_s28 }
   0x4   :  { %s350_s10 = smov 4   ;;  %s351_s11 = smov [#allocation2]  }
   0x5   :  { %38 = dma.hbm_to_vmem [thread:$0]  %s31_s26, 128, %s33_s28, [#allocation5], %s349_s9, %s349_s9, %s350_s10  }
   0x6   :  { %s22_s12 = sshll.u32 %s351_s11, 4  ;;  %s45_s15 = sshll.u32 %s421_s3, 4  ;;  %s23_s12 = int_to_ptr.vmem [resolvable:$true] %s22_s12  ;;  %s46_s15 = int_to_ptr.hbm [resolvable:$true] %s45_s15 }
   0x7   :  { %25 = dma.hbm_to_vmem [thread:$0]  %s21_s8, 128, %s23_s12, [#allocation3]  }
   0x8   :  { %s60_s17 = sshll.u32 %s423_s5, 4  ;;  %s352_s18 = smov [#allocation6]   ;;  %s61_s17 = int_to_ptr.hbm [resolvable:$true] %s60_s17 }
   0x9   :  { %s47_s19 = sshll.u32 %s352_s18, 4  ;;  %s353_s0 = smov [#allocation7]   ;;  %s48_s19 = int_to_ptr.vmem [resolvable:$true] %s47_s19 }
   0xa   :  { %53 = dma.hbm_to_vmem [thread:$0]  %s46_s15, 256, %s48_s19, [#allocation5], %s349_s9, %s349_s9, %s350_s10  }
   0xb   :  { %s62_s20 = sshll.u32 %s353_s0, 4  ;;  %s63_s20 = int_to_ptr.vmem [resolvable:$true] %s62_s20 }
   0xc   :  { %68 = dma.hbm_to_vmem [thread:$0]  %s61_s17, 256, %s63_s20, [#allocation8], %s349_s9, %s349_s9, %s350_s10  }
   0xd   :  { %342 = dma.done.wait [#allocation3], 128  }
   0xe   :  { %343 = vsyncadd [#allocation3], 4294967168 }
   0xf   :  { %344 = dma.done.wait [#allocation5], 384  }
  0x10   :  { %345 = vsyncadd [#allocation5], 4294966912 }
  0x11   :  { %346 = dma.done.wait [#allocation8], 256  }
  0x12   :  { %347 = vsyncadd [#allocation8], 4294967040  ;;  %v230_v0 = vld [vmem:[#allocation4] sm:$0xff]  ;;  %v88_v1 = vld [vmem:[#allocation2] sm:$0xff]  ;;  %vm102_vm0 = vcmask 130048   ;;  %vm141_vm1 = vcmask 261120  }
  0x13   :  { %v89_v2 = vpack.c.bf16 %v88_v1, %v88_v1  ;;  %113 = vmatpush.bf16.msra.mxu0 %v230_v0  ;;  %v232_v3 = vld [vmem:[#allocation6 + $0x8] sm:$0xff]  ;;  %v231_v4 = vld [vmem:[#allocation6] sm:$0xff]  ;;  %v241_v5 = vld [vmem:[%s420_s2] ss:$0 sm:$0xff]  ;;  %vm198_vm2 = vcmask 64512  }
  0x14   :  { %151 = vmatpush.bf16.msra.mxu1 %v232_v3  ;;  %v234_v11 = vld [vmem:[#allocation7 + $0x8] sm:$0xff]  ;;  %v233_v12 = vld [vmem:[#allocation7] sm:$0xff] }
  0x15   :  { %185 = vmatpush.bf16.msra.mxu2 %v234_v11  ;;  %v242_v13 = vld [vmem:[%s422_s4] ss:$0 sm:$0xff] }
  0x16   :  { %211 = vmatmul.msk.bf16.vlgmr.msra.gmra.mxu0 %vm102_vm0, %v89_v2  ;;  %v243_v19 = vld [vmem:[%s424_s6] ss:$0 sm:$0xff] }
  0x18   :  { %152 = vmatpush.bf16.msra.mxu1 %v231_v4 }
  0x19   :  { %186 = vmatpush.bf16.msra.mxu2 %v233_v12 }
  0x93   :  { %v115_v6 = vpop.f32.mrf.mxu0 }
  0x94   :  { %v116_v7 = vadd.f32 %v241_v5, %v115_v6 }
  0x96   :  { %v119_v8 = vmax.f32 %v116_v7, 0.0 }
  0x98   :  { %v120_v9 = vpack.c.bf16 %v119_v8, %v119_v8 }
  0x9a   :  { %220 = vmatmul.msk.bf16.vlgmr.msra.gmra.mxu1 %vm141_vm1, %v120_v9 }
  0x9b   :  { %v117_v10 = vpop.f32.mrf.mxu0 }
 0x117   :  { %v154_v14 = vpop.f32.mrf.mxu1 }
 0x118   :  { %v155_v15 = vadd.f32 %v242_v13, %v154_v14 }
 0x11a   :  { %v158_v16 = vmax.f32 %v155_v15, 0.0 }
 0x11c   :  { %v159_v17 = vpack.c.bf16 %v158_v16, %v158_v16 }
 0x11e   :  { %229 = vmatmul.msk.bf16.vlgmr.msra.gmra.mxu2 %vm141_vm1, %v159_v17 }
 0x11f   :  { %v156_v18 = vpop.f32.mrf.mxu1 }
 0x1a1   :  { %v188_v20 = vpop.f32.mrf.mxu2 }
 0x1a2   :  { %v196_v21 = vadd.f32 %v243_v19, %v188_v20 }
 0x1a4   :  { %244 = vtanh.f32 %v196_v21 }
 0x1a9   :  { %v190_v22 = vpop.f32.mrf.mxu2 }
 0x1aa   :  { %v245_v23 = vpop.eup %244 }
 0x1ab   :  { %199 = vst.msk [vmem:[%s425_s7] sm:$0xff] %vm198_vm2, %v245_v23 }
 0x1ac   :  { %204 = vsyncpa [#allocation3], 1 }
 0x1ad   :  { %205 = vsyncpa [#allocation5], 1 }
 0x1ae   :  { %206 = vsyncpa [#allocation8], 1 }

</bundles_post_ra>
